<compile_context>
chip_gen: v6e
topology: v6e:2x2x1
jax: 0.10.0
libtpu: 0.0.40
codegen_flags: <defaults>
</compile_context>

<pallas_src>
import jax
import jax.numpy as jnp
from jax.experimental import pallas as pl
from jax.experimental.pallas import tpu as pltpu


_PACK = 8  # batch rows packed into one row of the lane-dense slab (sublane width)


def _cdiv(a, b):
    return (a + b - 1) // b


def _round_up(a, b):
    return _cdiv(a, b) * b


def _mlp_kernel(x_ref,
                w1_ref, b1_ref,
                w2_ref, b2_ref,
                w3_ref, b3_ref,
                w4_ref, b4_ref,
                o_ref):
    """Block-diagonal-packed 4-layer MLP on a (tile_rows, 8*F) f32 slab."""
    x = x_ref[...]  # (tile_rows, 8*F) f32, streamed straight from HBM (no casts)

    # Layer 1: (tile, 8F) @ (8F, 8*24) -> (tile, 192)
    h = jnp.dot(x, w1_ref[...], preferred_element_type=jnp.float32) + b1_ref[...]
    h = jnp.maximum(h, 0.0)
    # Layer 2: (tile, 192) @ (192, 96) -> (tile, 96)
    h = jnp.dot(h, w2_ref[...], preferred_element_type=jnp.float32) + b2_ref[...]
    h = jnp.maximum(h, 0.0)
    # Layer 3: (tile, 96) @ (96, 48) -> (tile, 48)
    h = jnp.dot(h, w3_ref[...], preferred_element_type=jnp.float32) + b3_ref[...]
    h = jnp.maximum(h, 0.0)
    # Layer 4 (no activation): (tile, 48) @ (48, 8) -> (tile, 8)
    h = jnp.dot(h, w4_ref[...], preferred_element_type=jnp.float32) + b4_ref[...]

    o_ref[...] = h.astype(o_ref.dtype)


def _pack_params(params):
    """Block-diagonal packed weights (kron with I_8) + tiled biases, all f32.

    Tiny one-off arrays (< 200 KiB total); computed in the wrapper.
    """
    eye = jnp.eye(_PACK, dtype=jnp.float32)
    packed = []
    for i in range(1, 5):
        w = params[f"w{i}"].astype(jnp.float32)            # PyTorch (out, in) layout
        b = params[f"b{i}"].astype(jnp.float32).reshape(-1)  # (out,)
        wp = jnp.kron(eye, w.T)                            # (8*in, 8*out), block-diag
        bp = jnp.tile(b, _PACK).reshape(1, -1)             # (1, 8*out)
        packed += [wp, bp]
    return packed


def regression_model_forward(x, params, *, rows_per_tile=4096):
    """x: (B, in_features) f32.  params: PyTorch-layout w1..w4 (out,in), b1..b4 (out,).

    Returns (B, 1) f32.  rows_per_tile is in *packed* rows (1 packed row = 8 batch rows).
    """
    B, F = x.shape
    PF = _PACK * F

    # ----- tile selection --------------------------------------------------------
    n_rows = _cdiv(B, _PACK)                       # packed rows actually needed
    tile = max(8, min(int(rows_per_tile), 8192))   # cap keeps worst case << 48 MiB VMEM
    tile -= tile % 8
    tile = min(tile, _round_up(n_rows, 8))         # don't over-pad tiny batches
    if n_rows > 16 and _cdiv(n_rows, tile) == 1:
        # keep >= 2 grid steps so v7x's two TensorCores both get work
        tile = _round_up(_cdiv(n_rows, 2), 8)

    n_tiles = _cdiv(n_rows, tile)
    rows_p = n_tiles * tile
    Bp = rows_p * _PACK

    # ----- layout prep (f32 stream, free reshape; pad only if needed) -------------
    xp = x.astype(jnp.float32)
    if Bp != B:
        xp = jnp.pad(xp, ((0, Bp - B), (0, 0)))
    xp = xp.reshape(rows_p, PF)                    # contiguous -> metadata-only reshape

    w1p, b1p, w2p, b2p, w3p, b3p, w4p, b4p = _pack_params(params)

    def resident(a):  # full array, same block every step -> stays resident in VMEM
        return pl.BlockSpec(a.shape, lambda i: (0, 0))

    packed_params = (w1p, b1p, w2p, b2p, w3p, b3p, w4p, b4p)
    param_bytes = sum(int(a.size) * 4 for a in packed_params)
    layer_dims = [(PF, 24 * _PACK), (24 * _PACK, 12 * _PACK),
                  (12 * _PACK, 6 * _PACK), (6 * _PACK, 1 * _PACK)]
    cost = pl.CostEstimate(
        flops=2 * rows_p * sum(k * n for k, n in layer_dims),
        transcendentals=0,
        bytes_accessed=rows_p * PF * 4 + rows_p * _PACK * 4 + param_bytes,
    )

    out = pl.pallas_call(
        _mlp_kernel,
        out_shape=jax.ShapeDtypeStruct((rows_p, _PACK), jnp.float32),
        grid=(n_tiles,),
        in_specs=[
            pl.BlockSpec((tile, PF), lambda i: (i, 0)),
            resident(w1p), resident(b1p),
            resident(w2p), resident(b2p),
            resident(w3p), resident(b3p),
            resident(w4p), resident(b4p),
        ],
        out_specs=pl.BlockSpec((tile, _PACK), lambda i: (i, 0)),
        compiler_params=pltpu.CompilerParams(
            dimension_semantics=("parallel",),
            vmem_limit_bytes=48 * 1024 * 1024,   # > v5e's 16 MiB default, < v7x's 64 MiB
        ),
        cost_estimate=cost,
    )(xp, *packed_params)

    # (rows_p, 8) -> (Bp, 1) is a free contiguous reshape; slice off padded tail rows.
    return out.reshape(Bp, 1)[:B]


def init_params(key, in_features):
    """Mirror nn.Linear init U(-1/sqrt(fan_in), 1/sqrt(fan_in)); PyTorch (out,in) layout."""
    sizes = [(24, in_features), (12, 24), (6, 12), (1, 6)]
    params = {}
    keys = jax.random.split(key, 2 * len(sizes))
    for i, (fout, fin) in enumerate(sizes):
        bound = 1.0 / (fin ** 0.5)
        params[f"w{i + 1}"] = jax.random.uniform(
            keys[2 * i], (fout, fin), jnp.float32, -bound, bound)
        params[f"b{i + 1}"] = jax.random.uniform(
            keys[2 * i + 1], (fout,), jnp.float32, -bound, bound)
    return params


def reference_forward(x, params):
    """Pure-JAX f32 reference (same numerics as the kernel: f32 in, f32 accumulate)."""
    h = x.astype(jnp.float32)
    for i in range(1, 5):
        w, b = params[f"w{i}"], params[f"b{i}"]
        h = jnp.dot(h, w.T, preferred_element_type=jnp.float32) + b
        if i < 4:
            h = jnp.maximum(h, 0.0)
    return h


if __name__ == "__main__":
    key = jax.random.PRNGKey(0)
    kx, kp = jax.random.split(key)

    batch = 1000          # not a multiple of 8 or the tile: exercises pad + slice path
    in_features = 16
    x = jax.random.normal(kx, (batch, in_features), dtype=jnp.float32)
    params = init_params(kp, in_features)

    out = jax.block_until_ready(regression_model_forward(x, params))

    ref = reference_forward(x, params)
    assert out.shape == (batch, 1)
    max_err = float(jnp.max(jnp.abs(out - ref)))
    assert jnp.allclose(out, ref, atol=1e-3, rtol=1e-3), max_err

    print("KERNEL_OK")
</pallas_src>

<mosaic_0001>
module attributes {stable_mosaic.version = 11 : i64} {
  func.func @_mlp_kernel(%arg0: i32, %arg1: memref<64x128xf32, #tpu.memory_space<vmem>>, %arg2: memref<128x192xf32, #tpu.memory_space<vmem>>, %arg3: memref<1x192xf32, #tpu.memory_space<vmem>>, %arg4: memref<192x96xf32, #tpu.memory_space<vmem>>, %arg5: memref<1x96xf32, #tpu.memory_space<vmem>>, %arg6: memref<96x48xf32, #tpu.memory_space<vmem>>, %arg7: memref<1x48xf32, #tpu.memory_space<vmem>>, %arg8: memref<48x8xf32, #tpu.memory_space<vmem>>, %arg9: memref<1x8xf32, #tpu.memory_space<vmem>>, %arg10: memref<64x8xf32, #tpu.memory_space<vmem>>) attributes {dimension_semantics = [#tpu.dimension_semantics<parallel>], iteration_bounds = array<i64: 2>, scalar_prefetch = 0 : i64, scratch_operands = 0 : i64, tpu.core_type = #tpu.core_type<tc>, window_params = [{transform_indices = @transform_0, window_bounds = array<i64: 64, 128>}, {pipeline_mode = #tpu.pipeline_mode<synchronous>, transform_indices = @transform_1, window_bounds = array<i64: 128, 192>}, {pipeline_mode = #tpu.pipeline_mode<synchronous>, transform_indices = @transform_2, window_bounds = array<i64: 1, 192>}, {pipeline_mode = #tpu.pipeline_mode<synchronous>, transform_indices = @transform_3, window_bounds = array<i64: 192, 96>}, {pipeline_mode = #tpu.pipeline_mode<synchronous>, transform_indices = @transform_4, window_bounds = array<i64: 1, 96>}, {pipeline_mode = #tpu.pipeline_mode<synchronous>, transform_indices = @transform_5, window_bounds = array<i64: 96, 48>}, {pipeline_mode = #tpu.pipeline_mode<synchronous>, transform_indices = @transform_6, window_bounds = array<i64: 1, 48>}, {pipeline_mode = #tpu.pipeline_mode<synchronous>, transform_indices = @transform_7, window_bounds = array<i64: 48, 8>}, {pipeline_mode = #tpu.pipeline_mode<synchronous>, transform_indices = @transform_8, window_bounds = array<i64: 1, 8>}, {transform_indices = @transform_9, window_bounds = array<i64: 64, 8>}]} {
    %c0 = arith.constant 0 : index
    %c0_0 = arith.constant 0 : index
    %0 = vector.load %arg1[%c0, %c0_0] : memref<64x128xf32, #tpu.memory_space<vmem>>, vector<64x128xf32>
    %c0_1 = arith.constant 0 : index
    %c0_2 = arith.constant 0 : index
    %1 = vector.load %arg2[%c0_1, %c0_2] : memref<128x192xf32, #tpu.memory_space<vmem>>, vector<128x192xf32>
    %cst = arith.constant dense<0.000000e+00> : vector<64x192xf32>
    %2 = tpu.matmul %0, %1, %cst {dimension_numbers = #tpu.dot_dimension_numbers<[1], [0], [0], [1], [0, 0, 1, 1], [], []>} : vector<64x128xf32>, vector<128x192xf32>, vector<64x192xf32> -> vector<64x192xf32>
    %c0_3 = arith.constant 0 : index
    %c0_4 = arith.constant 0 : index
    %3 = vector.load %arg3[%c0_3, %c0_4] : memref<1x192xf32, #tpu.memory_space<vmem>>, vector<1x192xf32>
    %4 = vector.broadcast %3 : vector<1x192xf32> to vector<64x192xf32>
    %5 = arith.addf %2, %4 : vector<64x192xf32>
    %cst_5 = arith.constant 0.000000e+00 : f32
    %6 = vector.broadcast %cst_5 : f32 to vector<64x192xf32>
    %7 = arith.maximumf %5, %6 : vector<64x192xf32>
    %c0_6 = arith.constant 0 : index
    %c0_7 = arith.constant 0 : index
    %8 = vector.load %arg4[%c0_6, %c0_7] : memref<192x96xf32, #tpu.memory_space<vmem>>, vector<192x96xf32>
    %cst_8 = arith.constant dense<0.000000e+00> : vector<64x96xf32>
    %9 = tpu.matmul %7, %8, %cst_8 {dimension_numbers = #tpu.dot_dimension_numbers<[1], [0], [0], [1], [0, 0, 1, 1], [], []>} : vector<64x192xf32>, vector<192x96xf32>, vector<64x96xf32> -> vector<64x96xf32>
    %c0_9 = arith.constant 0 : index
    %c0_10 = arith.constant 0 : index
    %10 = vector.load %arg5[%c0_9, %c0_10] : memref<1x96xf32, #tpu.memory_space<vmem>>, vector<1x96xf32>
    %11 = vector.broadcast %10 : vector<1x96xf32> to vector<64x96xf32>
    %12 = arith.addf %9, %11 : vector<64x96xf32>
    %cst_11 = arith.constant 0.000000e+00 : f32
    %13 = vector.broadcast %cst_11 : f32 to vector<64x96xf32>
    %14 = arith.maximumf %12, %13 : vector<64x96xf32>
    %c0_12 = arith.constant 0 : index
    %c0_13 = arith.constant 0 : index
    %15 = vector.load %arg6[%c0_12, %c0_13] : memref<96x48xf32, #tpu.memory_space<vmem>>, vector<96x48xf32>
    %cst_14 = arith.constant dense<0.000000e+00> : vector<64x48xf32>
    %16 = tpu.matmul %14, %15, %cst_14 {dimension_numbers = #tpu.dot_dimension_numbers<[1], [0], [0], [1], [0, 0, 1, 1], [], []>} : vector<64x96xf32>, vector<96x48xf32>, vector<64x48xf32> -> vector<64x48xf32>
    %c0_15 = arith.constant 0 : index
    %c0_16 = arith.constant 0 : index
    %17 = vector.load %arg7[%c0_15, %c0_16] : memref<1x48xf32, #tpu.memory_space<vmem>>, vector<1x48xf32>
    %18 = vector.broadcast %17 : vector<1x48xf32> to vector<64x48xf32>
    %19 = arith.addf %16, %18 : vector<64x48xf32>
    %cst_17 = arith.constant 0.000000e+00 : f32
    %20 = vector.broadcast %cst_17 : f32 to vector<64x48xf32>
    %21 = arith.maximumf %19, %20 : vector<64x48xf32>
    %c0_18 = arith.constant 0 : index
    %c0_19 = arith.constant 0 : index
    %22 = vector.load %arg8[%c0_18, %c0_19] : memref<48x8xf32, #tpu.memory_space<vmem>>, vector<48x8xf32>
    %cst_20 = arith.constant dense<0.000000e+00> : vector<64x8xf32>
    %23 = tpu.matmul %21, %22, %cst_20 {dimension_numbers = #tpu.dot_dimension_numbers<[1], [0], [0], [1], [0, 0, 1, 1], [], []>} : vector<64x48xf32>, vector<48x8xf32>, vector<64x8xf32> -> vector<64x8xf32>
    %c0_21 = arith.constant 0 : index
    %c0_22 = arith.constant 0 : index
    %24 = vector.load %arg9[%c0_21, %c0_22] : memref<1x8xf32, #tpu.memory_space<vmem>>, vector<1x8xf32>
    %25 = vector.broadcast %24 : vector<1x8xf32> to vector<64x8xf32>
    %26 = arith.addf %23, %25 : vector<64x8xf32>
    %c0_23 = arith.constant 0 : index
    %c0_24 = arith.constant 0 : index
    %27 = vector.load %arg10[%c0_23, %c0_24] : memref<64x8xf32, #tpu.memory_space<vmem>>, vector<64x8xf32>
    tpu.vector_store %arg10[%c0_23, %c0_24], %26 {strides = array<i32>} : memref<64x8xf32, #tpu.memory_space<vmem>>, vector<64x8xf32>,
    return
  }
  func.func @transform_0(%arg0: i32) -> (i32, i32) {
    %c0_i32 = arith.constant 0 : i32
    %c0_i32_0 = arith.constant 0 : i32
    return %arg0, %c0_i32 : i32, i32
  }
  func.func @transform_1(%arg0: i32) -> (i32, i32) {
    %c0_i32 = arith.constant 0 : i32
    %c0_i32_0 = arith.constant 0 : i32
    %c0_i32_1 = arith.constant 0 : i32
    return %c0_i32, %c0_i32_0 : i32, i32
  }
  func.func @transform_2(%arg0: i32) -> (i32, i32) {
    %c0_i32 = arith.constant 0 : i32
    %c0_i32_0 = arith.constant 0 : i32
    %c0_i32_1 = arith.constant 0 : i32
    return %c0_i32, %c0_i32_0 : i32, i32
  }
  func.func @transform_3(%arg0: i32) -> (i32, i32) {
    %c0_i32 = arith.constant 0 : i32
    %c0_i32_0 = arith.constant 0 : i32
    %c0_i32_1 = arith.constant 0 : i32
    return %c0_i32, %c0_i32_0 : i32, i32
  }
  func.func @transform_4(%arg0: i32) -> (i32, i32) {
    %c0_i32 = arith.constant 0 : i32
    %c0_i32_0 = arith.constant 0 : i32
    %c0_i32_1 = arith.constant 0 : i32
    return %c0_i32, %c0_i32_0 : i32, i32
  }
  func.func @transform_5(%arg0: i32) -> (i32, i32) {
    %c0_i32 = arith.constant 0 : i32
    %c0_i32_0 = arith.constant 0 : i32
    %c0_i32_1 = arith.constant 0 : i32
    return %c0_i32, %c0_i32_0 : i32, i32
  }
  func.func @transform_6(%arg0: i32) -> (i32, i32) {
    %c0_i32 = arith.constant 0 : i32
    %c0_i32_0 = arith.constant 0 : i32
    %c0_i32_1 = arith.constant 0 : i32
    return %c0_i32, %c0_i32_0 : i32, i32
  }
  func.func @transform_7(%arg0: i32) -> (i32, i32) {
    %c0_i32 = arith.constant 0 : i32
    %c0_i32_0 = arith.constant 0 : i32
    %c0_i32_1 = arith.constant 0 : i32
    return %c0_i32, %c0_i32_0 : i32, i32
  }
  func.func @transform_8(%arg0: i32) -> (i32, i32) {
    %c0_i32 = arith.constant 0 : i32
    %c0_i32_0 = arith.constant 0 : i32
    %c0_i32_1 = arith.constant 0 : i32
    return %c0_i32, %c0_i32_0 : i32, i32
  }
  func.func @transform_9(%arg0: i32) -> (i32, i32) {
    %c0_i32 = arith.constant 0 : i32
    %c0_i32_0 = arith.constant 0 : i32
    return %arg0, %c0_i32 : i32, i32
  }
}

</mosaic_0001>

<bundles_post_ra>
// kernel: tpu_custom_call.1
= control target key start
LH: loop header
LB: loop body
LE: loop exit
PB: predicated region body
PF: predicated region fallthrough
CT: control target
= control target key end

     0   :  { %s1263_s30 = smov 0   ;;  %s1598_s0 = inlined_call_operand.vmem [shape: f32[128,128], index: 0, kind: input, shape index: {}]   ;;  %s1599_s1 = inlined_call_operand.vmem [shape: f32[128,192], index: 1, kind: input, shape index: {}]   ;;  %s1600_s2 = inlined_call_operand.vmem [shape: f32[1,192], index: 2, kind: input, shape index: {}]   ;;  %s1601_s3 = inlined_call_operand.vmem [shape: f32[192,96], index: 3, kind: input, shape index: {}]   ;;  %s1602_s4 = inlined_call_operand.vmem [shape: f32[1,96], index: 4, kind: input, shape index: {}]   ;;  %s1603_s5 = inlined_call_operand.vmem [shape: f32[96,48], index: 5, kind: input, shape index: {}]   ;;  %s1604_s6 = inlined_call_operand.vmem [shape: f32[1,48], index: 6, kind: input, shape index: {}]   ;;  %s1605_s7 = inlined_call_operand.vmem [shape: f32[48,8], index: 7, kind: input, shape index: {}]   ;;  %s1606_s8 = inlined_call_operand.vmem [shape: f32[1,8], index: 8, kind: input, shape index: {}]   ;;  %s1607_s9 = inlined_call_operand.vmem [shape: f32[128,8], index: 9, kind: output, shape index: {}]  }
   0x1 LB: > { %s1051_s10 = sadd.s32 4294967295, %s1210_s30   ;;  %p1055_p0 = scmp.ge.s32.totalorder %s1210_s30, 1  ;;  %s1210_s30 = sphi %s1263_s30, %s19_s30  }
   0x2   : > { %p288_p1 = scmp.lt.s32.totalorder %s1210_s30, 3 }
   0x4   : > { %p289_p2 = pnand %p1055_p0, %p288_p1 }
   0x5   : > { %s1056_s24 = sshll.u32 (!%p289_p2), %s1051_s10, 3 }
   0x6   : > { %292 = sbr.rel (%p289_p2) target bundleno = 867 (0x363), region = 56  ;;  %p325_p3 = scmp.lt.s32.totalorder (!%p289_p2), %s1056_s24, 15 }
   0xb   : > { %v375_v0 = vld [vmem:[%s1599_s1 + $0xf8] sm:$0xff]  ;;  %v374_v1 = vld [vmem:[%s1599_s1 + $0xf0] sm:$0xff]  ;;  %v373_v2 = vld [vmem:[%s1599_s1 + $0xe8] sm:$0xff]  ;;  %v1212_v4 = vmov 0.0   ;;  %s1609_s24 = smov (!%p325_p3, %s1056_s24), 15  ;;  %vm548_vm0 = vcmask 523264  }
   0xc   : > { %388 = vmatprep.subr.mxu0 %v375_v0  ;;  %v372_v3 = vld [vmem:[%s1599_s1 + $0xe0] sm:$0xff]  ;;  %452 = vmatprep.mubr.f32.mxu0 %v1212_v4  ;;  %v371_v5 = vld [vmem:[%s1599_s1 + $0xd8] sm:$0xff]  ;;  %v370_v6 = vld [vmem:[%s1599_s1 + $0xd0] sm:$0xff]  ;;  %s1057_s22 = sshll.u32 %s1609_s24, 3  ;;  %vm705_vm1 = vcmask 785408   ;;  %vm856_vm2 = vcmask 392192  }
   0xd   : > { %389 = vmatpush1.msra.mxu0 %v374_v1  ;;  %573 = vmatprep.subr.mxu1 %v1212_v4  ;;  %v369_v7 = vld [vmem:[%s1599_s1 + $0xc8] sm:$0xff]  ;;  %v368_v8 = vld [vmem:[%s1599_s1 + $0xc0] sm:$0xff]  ;;  %v367_v9 = vld [vmem:[%s1599_s1 + $0xb8] sm:$0xff]  ;;  %s1404_s14 = scalar_lea.vmem %s1598_s0, %s1057_s22  ;;  %s334_s28 = scalar_lea.vmem %s1607_s9, %s1057_s22  ;;  %vm986_vm3 = vcmask 64512  }
   0xe   : > { %390 = vmatprep.subr.mxu0 %v373_v2  ;;  %v366_v10 = vld [vmem:[%s1599_s1 + $0xb0] sm:$0xff]  ;;  %v365_v11 = vld [vmem:[%s1599_s1 + $0xa8] sm:$0xff]  ;;  %v364_v12 = vld [vmem:[%s1599_s1 + $0xa0] sm:$0xff] }
   0xf   : > { %391 = vmatpush1.msra.mxu0 %v372_v3  ;;  %v363_v13 = vld [vmem:[%s1599_s1 + $0x98] sm:$0xff]  ;;  %v362_v14 = vld [vmem:[%s1599_s1 + $0x90] sm:$0xff]  ;;  %v361_v15 = vld [vmem:[%s1599_s1 + $0x88] sm:$0xff] }
  0x10   : > { %392 = vmatprep.subr.mxu0 %v371_v5  ;;  %v360_v16 = vld [vmem:[%s1599_s1 + $0x80] sm:$0xff]  ;;  %v532_v17 = vld [vmem:[%s1601_s3 + $0x78] sm:$0xff]  ;;  %v531_v18 = vld [vmem:[%s1601_s3 + $0x70] sm:$0xff] }
  0x11   : > { %393 = vmatpush1.msra.mxu0 %v370_v6  ;;  %v359_v19 = vld [vmem:[%s1599_s1 + $0x78] sm:$0xff]  ;;  %574 = vmatpush1.msra.mxu1 %v532_v17  ;;  %v358_v20 = vld [vmem:[%s1599_s1 + $0x70] sm:$0xff]  ;;  %v530_v21 = vld [vmem:[%s1601_s3 + $0x68] sm:$0xff] }
  0x12   : > { %394 = vmatprep.subr.mxu0 %v369_v7  ;;  %575 = vmatprep.subr.mxu1 %v1212_v4  ;;  %v357_v22 = vld [vmem:[%s1599_s1 + $0x68] sm:$0xff]  ;;  %v356_v23 = vld [vmem:[%s1599_s1 + $0x60] sm:$0xff]  ;;  %v355_v25 = vld [vmem:[%s1599_s1 + $0x58] sm:$0xff] }
  0x13   : > { %395 = vmatpush1.msra.mxu0 %v368_v8  ;;  %576 = vmatpush1.msra.mxu1 %v531_v18  ;;  %v529_v24 = vld [vmem:[%s1601_s3 + $0x60] sm:$0xff]  ;;  %v354_v26 = vld [vmem:[%s1599_s1 + $0x50] sm:$0xff]  ;;  %v528_v27 = vld [vmem:[%s1601_s3 + $0x58] sm:$0xff] }
  0x14   : > { %396 = vmatprep.subr.mxu0 %v367_v9  ;;  %577 = vmatprep.subr.mxu1 %v1212_v4  ;;  %v353_v28 = vld [vmem:[%s1599_s1 + $0x48] sm:$0xff]  ;;  %v352_v29 = vld [vmem:[%s1599_s1 + $0x40] sm:$0xff]  ;;  %v527_v30 = vld [vmem:[%s1601_s3 + $0x50] sm:$0xff]  ;;  %v378_v9 = vlaneseq }
  0x15   : > { %397 = vmatpush1.msra.mxu0 %v366_v10  ;;  %578 = vmatpush1.msra.mxu1 %v530_v21  ;;  %v351_v31 = vld [vmem:[%s1599_s1 + $0x38] sm:$0xff]  ;;  %v350_v32 = vld [vmem:[%s1599_s1 + $0x30] sm:$0xff]  ;;  %v526_v33 = vld [vmem:[%s1601_s3 + $0x48] sm:$0xff] }
  0x16   : > { %398 = vmatprep.subr.mxu0 %v365_v11  ;;  %579 = vmatprep.subr.mxu1 %v1212_v4  ;;  %v349_v34 = vld [vmem:[%s1599_s1 + $0x28] sm:$0xff]  ;;  %v348_v35 = vld [vmem:[%s1599_s1 + $0x20] sm:$0xff]  ;;  %v347_v37 = vld [vmem:[%s1599_s1 + $0x18] sm:$0xff]  ;;  %v379_v10 = vshrl.u32 %v378_v9, 7 }
  0x17   : > { %399 = vmatpush1.msra.mxu0 %v364_v12  ;;  %580 = vmatpush1.msra.mxu1 %v529_v24  ;;  %v525_v36 = vld [vmem:[%s1601_s3 + $0x40] sm:$0xff]  ;;  %v346_v38 = vld [vmem:[%s1599_s1 + $0x10] sm:$0xff]  ;;  %v524_v39 = vld [vmem:[%s1601_s3 + $0x38] sm:$0xff] }
  0x18   : > { %400 = vmatprep.subr.mxu0 %v363_v13  ;;  %581 = vmatprep.subr.mxu1 %v1212_v4  ;;  %v345_v40 = vld [vmem:[%s1599_s1 + $0x8] sm:$0xff]  ;;  %v344_v41 = vld [vmem:[%s1599_s1] sm:$0xff]  ;;  %v523_v42 = vld [vmem:[%s1601_s3 + $0x30] sm:$0xff]  ;;  %v380_v11 = vsub.s32 0, %v379_v10  ;;  %v384_v13 = vsub.s32 1, %v379_v10 }
  0x19   : > { %401 = vmatpush1.msra.mxu0 %v362_v14  ;;  %582 = vmatpush1.msra.mxu1 %v528_v27  ;;  %v336_v43 = vld [vmem:[%s1404_s14] sm:$0xff]  ;;  %v522_v44 = vld [vmem:[%s1601_s3 + $0x28] sm:$0xff]  ;;  %v520_v47 = vld [vmem:[%s1601_s3 + $0x18] sm:$0xff] }
  0x1a   : > { %402 = vmatprep.subr.mxu0 %v361_v15  ;;  %583 = vmatprep.subr.mxu1 %v1212_v4  ;;  %v521_v45 = vld [vmem:[%s1601_s3 + $0x20] sm:$0xff]  ;;  %v337_v46 = vld [vmem:[%s1404_s14 + $0x8] sm:$0xff]  ;;  %v519_v48 = vld [vmem:[%s1601_s3 + $0x10] sm:$0xff] }
  0x1b   : > { %403 = vmatpush1.msra.mxu0 %v360_v16  ;;  %584 = vmatpush1.msra.mxu1 %v527_v30  ;;  %v338_v49 = vld [vmem:[%s1404_s14 + $0x10] sm:$0xff]  ;;  %v518_v50 = vld [vmem:[%s1601_s3 + $0x8] sm:$0xff]  ;;  %v517_v51 = vld [vmem:[%s1601_s3] sm:$0xff] }
  0x1c   : > { %404 = vmatprep.subr.mxu0 %v359_v19  ;;  %585 = vmatprep.subr.mxu1 %v1212_v4  ;;  %v339_v52 = vld [vmem:[%s1404_s14 + $0x18] sm:$0xff]  ;;  %v539_v54 = vld [vmem:[%s1601_s3 + $0xb0] sm:$0xff]  ;;  %v340_v55 = vld [vmem:[%s1404_s14 + $0x20] sm:$0xff] }
  0x1d   : > { %405 = vmatpush1.msra.mxu0 %v358_v20  ;;  %586 = vmatpush1.msra.mxu1 %v526_v33  ;;  %v540_v53 = vld [vmem:[%s1601_s3 + $0xb8] sm:$0xff]  ;;  %v538_v56 = vld [vmem:[%s1601_s3 + $0xa8] sm:$0xff]  ;;  %v537_v57 = vld [vmem:[%s1601_s3 + $0xa0] sm:$0xff] }
  0x1e   : > { %406 = vmatprep.subr.mxu0 %v357_v22  ;;  %587 = vmatprep.subr.mxu1 %v1212_v4  ;;  %v341_v58 = vld [vmem:[%s1404_s14 + $0x28] sm:$0xff]  ;;  %v342_v59 = vld [vmem:[%s1404_s14 + $0x30] sm:$0xff]  ;;  %v343_v60 = vld [vmem:[%s1404_s14 + $0x38] sm:$0xff] }
  0x1f   : > { %407 = vmatpush1.msra.mxu0 %v356_v23  ;;  %588 = vmatpush1.msra.mxu1 %v525_v36  ;;  %v536_v61 = vld [vmem:[%s1601_s3 + $0x98] sm:$0xff]  ;;  %v535_v62 = vld [vmem:[%s1601_s3 + $0x90] sm:$0xff]  ;;  %v534_v63 = vld [vmem:[%s1601_s3 + $0x88] sm:$0xff] }
  0x20   : > { %408 = vmatprep.subr.mxu0 %v355_v25  ;;  %589 = vmatprep.subr.mxu1 %v1212_v4  ;;  %v533_v0 = vld [vmem:[%s1601_s3 + $0x80] sm:$0xff]  ;;  %v697_v1 = vld [vmem:[%s1603_s5 + $0x58] sm:$0xff]  ;;  %v696_v2 = vld [vmem:[%s1603_s5 + $0x50] sm:$0xff] }
  0x21   : > { %409 = vmatpush1.msra.mxu0 %v354_v26  ;;  %590 = vmatpush1.msra.mxu1 %v524_v39  ;;  %v695_v3 = vld [vmem:[%s1603_s5 + $0x48] sm:$0xff]  ;;  %v693_v5 = vld [vmem:[%s1603_s5 + $0x38] sm:$0xff]  ;;  %v692_v6 = vld [vmem:[%s1603_s5 + $0x30] sm:$0xff] }
  0x22   : > { %410 = vmatprep.subr.mxu0 %v353_v28  ;;  %591 = vmatprep.subr.mxu1 %v1212_v4  ;;  %v691_v7 = vld [vmem:[%s1603_s5 + $0x28] sm:$0xff]  ;;  %v690_v8 = vld [vmem:[%s1603_s5 + $0x20] sm:$0xff] }
  0x23   : > { %411 = vmatpush1.msra.mxu0 %v352_v29  ;;  %592 = vmatpush1.msra.mxu1 %v523_v42  ;;  %v376_v12 = vld [vmem:[%s1600_s2] sm:$0x3] }
  0x24   : > { %412 = vmatprep.subr.mxu0 %v351_v31  ;;  %593 = vmatprep.subr.mxu1 %v1212_v4  ;;  %v381_v14 = vrot.slane %v376_v12, %v380_v11  ;;  %v385_v15 = vrot.slane %v376_v12, %v384_v13 }
  0x25   : > { %413 = vmatpush1.msra.mxu0 %v350_v32  ;;  %594 = vmatpush1.msra.mxu1 %v522_v44 }
  0x26   : > { %414 = vmatprep.subr.mxu0 %v349_v34  ;;  %595 = vmatprep.subr.mxu1 %v1212_v4 }
  0x27   : > { %415 = vmatpush1.msra.mxu0 %v348_v35  ;;  %596 = vmatpush1.msra.mxu1 %v521_v45 }
  0x28   : > { %416 = vmatprep.subr.mxu0 %v347_v37  ;;  %597 = vmatprep.subr.mxu1 %v1212_v4 }
  0x29   : > { %417 = vmatpush1.msra.mxu0 %v346_v38  ;;  %598 = vmatpush1.msra.mxu1 %v520_v47 }
  0x2a   : > { %418 = vmatprep.subr.mxu0 %v345_v40  ;;  %599 = vmatprep.subr.mxu1 %v1212_v4 }
  0x2b   : > { %419 = vmatpush1.msra.mxu0 %v344_v41  ;;  %600 = vmatpush1.msra.mxu1 %v519_v48 }
  0x2c   : > { %453 = vmatmul.mubr.f32.vlgmr.msra.gmra.mxu0 %v336_v43  ;;  %601 = vmatprep.subr.mxu1 %v1212_v4 }
  0x2d   : > { %458 = vmatprep.mubr.f32.mxu0 %v1212_v4  ;;  %602 = vmatpush1.msra.mxu1 %v518_v50 }
  0x2e   : > { %603 = vmatprep.subr.mxu1 %v1212_v4  ;;  %1123 = vmatprep.subr.mxu0 %v697_v1 }
  0x2f   : > { %604 = vmatpush1.msra.mxu1 %v517_v51  ;;  %1124 = vmatpush3.msra.mxu0 %v697_v1  ;;  %v688_v1 = vld [vmem:[%s1603_s5 + $0x10] sm:$0xff] }
  0x30   : > { %459 = vmatmul.mubr.f32.gmra.mxu0 %v337_v46  ;;  %621 = vmatprep.subr.mxu1 %v1212_v4 }
  0x31   : > { %464 = vmatprep.mubr.f32.mxu0 %v1212_v4  ;;  %622 = vmatpush2.msra.mxu1 %v540_v53 }
  0x32   : > { %623 = vmatprep.subr.mxu1 %v1212_v4  ;;  %1125 = vmatprep.subr.mxu0 %v696_v2 }
  0x33   : > { %624 = vmatpush2.msra.mxu1 %v539_v54  ;;  %1126 = vmatpush3.msra.mxu0 %v696_v2  ;;  %v687_v2 = vld [vmem:[%s1603_s5 + $0x8] sm:$0xff] }
  0x34   : > { %465 = vmatmul.mubr.f32.gmra.mxu0 %v338_v49  ;;  %625 = vmatprep.subr.mxu1 %v1212_v4 }
  0x35   : > { %470 = vmatprep.mubr.f32.mxu0 %v1212_v4  ;;  %626 = vmatpush2.msra.mxu1 %v538_v56 }
  0x36   : > { %627 = vmatprep.subr.mxu1 %v1212_v4  ;;  %1127 = vmatprep.subr.mxu0 %v695_v3 }
  0x37   : > { %628 = vmatpush2.msra.mxu1 %v537_v57  ;;  %1128 = vmatpush3.msra.mxu0 %v695_v3  ;;  %v686_v3 = vld [vmem:[%s1603_s5] sm:$0xff] }
  0x38   : > { %471 = vmatmul.mubr.f32.gmra.mxu0 %v339_v52  ;;  %629 = vmatprep.subr.mxu1 %v1212_v4 }
  0x39   : > { %476 = vmatprep.mubr.f32.mxu0 %v1212_v4  ;;  %630 = vmatpush2.msra.mxu1 %v536_v61 }
  0x3a   : > { %631 = vmatprep.subr.mxu1 %v1212_v4 }
  0x3b   : > { %632 = vmatpush2.msra.mxu1 %v535_v62 }
  0x3c   : > { %477 = vmatmul.mubr.f32.gmra.mxu0 %v340_v55  ;;  %633 = vmatprep.subr.mxu1 %v1212_v4 }
  0x3d   : > { %482 = vmatprep.mubr.f32.mxu0 %v1212_v4  ;;  %634 = vmatpush2.msra.mxu1 %v534_v63 }
  0x3e   : > { %635 = vmatprep.subr.mxu1 %v1212_v4 }
  0x3f   : > { %636 = vmatpush2.msra.mxu1 %v533_v0  ;;  %v689_v0 = vld [vmem:[%s1603_s5 + $0x18] sm:$0xff] }
  0x40   : > { %483 = vmatmul.mubr.f32.gmra.mxu0 %v341_v58 }
  0x41   : > { %488 = vmatprep.mubr.f32.mxu0 %v1212_v4 }
  0x44   : > { %489 = vmatmul.mubr.f32.gmra.mxu0 %v342_v59 }
  0x45   : > { %494 = vmatprep.mubr.f32.mxu0 %v1212_v4  ;;  %v694_v4 = vld [vmem:[%s1603_s5 + $0x40] sm:$0xff] }
  0x46   : > { %1129 = vmatprep.subr.mxu0 %v694_v4 }
  0x47   : > { %1130 = vmatpush3.msra.mxu0 %v694_v4  ;;  %v848_v4 = vld [vmem:[%s1605_s7 + $0x28] sm:$0xff] }
  0x48   : > { %495 = vmatmul.mubr.f32.gmra.mxu0 %v343_v60  ;;  %1131 = vmatprep.subr.mxu0 %v693_v5 }
  0x49   : > { %1132 = vmatpush3.msra.mxu0 %v693_v5  ;;  %1183 = vmatprep.subr.mxu1 %v848_v4  ;;  %v847_v5 = vld [vmem:[%s1605_s7 + $0x20] sm:$0xff] }
  0x4a   : > { %1133 = vmatprep.subr.mxu0 %v692_v6 }
  0x4b   : > { %1134 = vmatpush3.msra.mxu0 %v692_v6  ;;  %v1060_v6 = vld [vmem:[%s1602_s4] ss:$0 sm:$0xff] }
  0x4c   : > { %1135 = vmatprep.subr.mxu0 %v691_v7 }
  0x4d   : > { %1136 = vmatpush3.msra.mxu0 %v691_v7 }
  0x4e   : > { %1137 = vmatprep.subr.mxu0 %v690_v8 }
  0x4f   : > { %1138 = vmatpush3.msra.mxu0 %v690_v8 }
  0x50   : > { %1139 = vmatprep.subr.mxu0 %v689_v0 }
  0x51   : > { %1140 = vmatpush3.msra.mxu0 %v689_v0 }
  0x52   : > { %1141 = vmatprep.subr.mxu0 %v688_v1 }
  0x53   : > { %1142 = vmatpush3.msra.mxu0 %v688_v1 }
  0x54   : > { %1143 = vmatprep.subr.mxu0 %v687_v2 }
  0x55   : > { %1144 = vmatpush3.msra.mxu0 %v687_v2 }
  0x56   : > { %1145 = vmatprep.subr.mxu0 %v686_v3 }
  0x57   : > { %1146 = vmatpush3.msra.mxu0 %v686_v3 }
  0x58   : > { %1159 = vmatprep.subr.mxu0 %v848_v4 }
  0xec   : > { %v454_v16 = vpop.f32.mrf.mxu0 }
  0xed   : > { %v455_v17 = vadd.f32 %v454_v16, %v381_v14 }
  0xee   : > { %v456_v18 = vpop.f32.mrf.mxu0 }
  0xef   : > { %v457_v19 = vadd.f32 %v456_v18, %v385_v15  ;;  %v501_v22 = vmax.f32 %v455_v17, 0.0 }
  0xf0   : > { %v460_v20 = vpop.f32.mrf.mxu0 }
  0xf1   : > { %v502_v21 = vmax.f32 %v457_v19, 0.0  ;;  %v461_v23 = vadd.f32 %v460_v20, %v381_v14 }
  0xf2   : > { %v462_v24 = vpop.f32.mrf.mxu0 }
  0xf3   : > { %v463_v25 = vadd.f32 %v462_v24, %v385_v15  ;;  %1061 = vmatprep.mubr.msk.f32.mxu1 %vm548_vm0, %v502_v21  ;;  %v503_v28 = vmax.f32 %v461_v23, 0.0 }
  0xf4   : > { %v466_v26 = vpop.f32.mrf.mxu0  ;;  %638 = vmatmul.mubr.f32.vlgmr.msra.gmra.mxu1 %v501_v22 }
  0xf5   : > { %v504_v27 = vmax.f32 %v463_v25, 0.0  ;;  %v467_v29 = vadd.f32 %v466_v26, %v381_v14  ;;  %1189 = vmatpush3.msra.mxu1 %v848_v4 }
  0xf6   : > { %v468_v30 = vpop.f32.mrf.mxu0  ;;  %1184 = vmatprep.subr.mxu1 %v847_v5 }
  0xf7   : > { %v469_v31 = vadd.f32 %v468_v30, %v385_v15  ;;  %1062 = vmatprep.mubr.msk.f32.mxu1 %vm548_vm0, %v504_v27  ;;  %v505_v34 = vmax.f32 %v467_v29, 0.0  ;;  %1190 = vmatpush3.msra.mxu1 %v847_v5 }
  0xf8   : > { %v472_v32 = vpop.f32.mrf.mxu0  ;;  %643 = vmatmul.mubr.f32.gmra.mxu1 %v503_v28 }
  0xf9   : > { %v506_v33 = vmax.f32 %v469_v31, 0.0  ;;  %v473_v35 = vadd.f32 %v472_v32, %v381_v14 }
  0xfa   : > { %v474_v36 = vpop.f32.mrf.mxu0 }
  0xfb   : > { %v475_v37 = vadd.f32 %v474_v36, %v385_v15  ;;  %1063 = vmatprep.mubr.msk.f32.mxu1 %vm548_vm0, %v506_v33  ;;  %v507_v40 = vmax.f32 %v473_v35, 0.0 }
  0xfc   : > { %v478_v38 = vpop.f32.mrf.mxu0  ;;  %648 = vmatmul.mubr.f32.gmra.mxu1 %v505_v34 }
  0xfd   : > { %v508_v39 = vmax.f32 %v475_v37, 0.0  ;;  %v479_v41 = vadd.f32 %v478_v38, %v381_v14 }
  0xfe   : > { %v480_v42 = vpop.f32.mrf.mxu0 }
  0xff   : > { %v481_v43 = vadd.f32 %v480_v42, %v385_v15  ;;  %1064 = vmatprep.mubr.msk.f32.mxu1 %vm548_vm0, %v508_v39  ;;  %v509_v46 = vmax.f32 %v479_v41, 0.0  ;;  %v846_v39 = vld [vmem:[%s1605_s7 + $0x18] sm:$0xff]  ;;  %v844_v41 = vld [vmem:[%s1605_s7 + $0x8] sm:$0xff]  ;;  %v843_v42 = vld [vmem:[%s1605_s7] sm:$0xff] }
 0x100   : > { %v484_v44 = vpop.f32.mrf.mxu0  ;;  %653 = vmatmul.mubr.f32.gmra.mxu1 %v507_v40  ;;  %1185 = vmatprep.subr.mxu1 %v846_v39  ;;  %v845_v40 = vld [vmem:[%s1605_s7 + $0x10] sm:$0xff] }
 0x101   : > { %v510_v45 = vmax.f32 %v481_v43, 0.0  ;;  %v485_v47 = vadd.f32 %v484_v44, %v381_v14  ;;  %1191 = vmatpush3.msra.mxu1 %v846_v39  ;;  %v1069_v43 = vld [vmem:[%s1604_s6] ss:$0 sm:$0xff] }
 0x102   : > { %v486_v48 = vpop.f32.mrf.mxu0  ;;  %1186 = vmatprep.subr.mxu1 %v845_v40 }
 0x103   : > { %v487_v49 = vadd.f32 %v486_v48, %v385_v15  ;;  %1065 = vmatprep.mubr.msk.f32.mxu1 %vm548_vm0, %v510_v45  ;;  %v511_v52 = vmax.f32 %v485_v47, 0.0  ;;  %1192 = vmatpush3.msra.mxu1 %v845_v40 }
 0x104   : > { %v490_v50 = vpop.f32.mrf.mxu0  ;;  %658 = vmatmul.mubr.f32.gmra.mxu1 %v509_v46  ;;  %1187 = vmatprep.subr.mxu1 %v844_v41 }
 0x105   : > { %v512_v51 = vmax.f32 %v487_v49, 0.0  ;;  %v491_v53 = vadd.f32 %v490_v50, %v381_v14  ;;  %1193 = vmatpush3.msra.mxu1 %v844_v41 }
 0x106   : > { %v492_v54 = vpop.f32.mrf.mxu0  ;;  %1188 = vmatprep.subr.mxu1 %v843_v42 }
 0x107   : > { %v493_v55 = vadd.f32 %v492_v54, %v385_v15  ;;  %1066 = vmatprep.mubr.msk.f32.mxu1 %vm548_vm0, %v512_v51  ;;  %v513_v58 = vmax.f32 %v491_v53, 0.0  ;;  %1194 = vmatpush3.msra.mxu1 %v843_v42 }
 0x108   : > { %v496_v56 = vpop.f32.mrf.mxu0  ;;  %663 = vmatmul.mubr.f32.gmra.mxu1 %v511_v52 }
 0x109   : > { %v514_v57 = vmax.f32 %v493_v55, 0.0  ;;  %v497_v59 = vadd.f32 %v496_v56, %v381_v14 }
 0x10a   : > { %v498_v60 = vpop.f32.mrf.mxu0 }
 0x10b   : > { %v499_v61 = vadd.f32 %v498_v60, %v385_v15  ;;  %1067 = vmatprep.mubr.msk.f32.mxu1 %vm548_vm0, %v514_v57  ;;  %v515_v63 = vmax.f32 %v497_v59, 0.0 }
 0x10c   : > { %668 = vmatmul.mubr.f32.gmra.mxu1 %v513_v58 }
 0x10d   : > { %v516_v62 = vmax.f32 %v499_v61, 0.0 }
 0x10f   : > { %1068 = vmatprep.mubr.msk.f32.mxu1 %vm548_vm0, %v516_v62 }
 0x110   : > { %673 = vmatmul.mubr.f32.gmra.mxu1 %v515_v63 }
 0x1b4   : > { %v639_v7 = vpop.f32.mrf.mxu1 }
 0x1b5   : > { %v640_v8 = vadd.f32 %v1060_v6, %v639_v7 }
 0x1b6   : > { %v641_v9 = vpop.f32.mrf.mxu1 }
 0x1b7   : > { %v678_v10 = vmax.f32 %v640_v8, 0.0 }
 0x1b8   : > { %v644_v11 = vpop.f32.mrf.mxu1 }
 0x1b9   : > { %v645_v12 = vadd.f32 %v1060_v6, %v644_v11  ;;  %1147 = vmatprep.mubr.msk.f32.mxu0 %vm705_vm1, %v678_v10 }
 0x1ba   : > { %v646_v13 = vpop.f32.mrf.mxu1 }
 0x1bb   : > { %v679_v14 = vmax.f32 %v645_v12, 0.0 }
 0x1bc   : > { %v649_v15 = vpop.f32.mrf.mxu1 }
 0x1bd   : > { %v650_v16 = vadd.f32 %v1060_v6, %v649_v15  ;;  %1148 = vmatmul.mubr.msk.f32.vlgmr.msra.gmra.mxu0 %vm705_vm1, %v679_v14 }
 0x1be   : > { %v651_v17 = vpop.f32.mrf.mxu1  ;;  %1160 = vmatpush3.msra.mxu0 %v848_v4  ;;  %v1078_v4 = vld [vmem:[%s1606_s8] ss:$0 sm:$0xff] }
 0x1bf   : > { %v680_v18 = vmax.f32 %v650_v16, 0.0  ;;  %1161 = vmatprep.subr.mxu0 %v847_v5 }
 0x1c0   : > { %v654_v19 = vpop.f32.mrf.mxu1  ;;  %1162 = vmatpush3.msra.mxu0 %v847_v5 }
 0x1c1   : > { %v655_v20 = vadd.f32 %v1060_v6, %v654_v19  ;;  %1150 = vmatprep.mubr.msk.f32.mxu0 %vm705_vm1, %v680_v18  ;;  %1163 = vmatprep.subr.mxu0 %v846_v39 }
 0x1c2   : > { %v656_v21 = vpop.f32.mrf.mxu1  ;;  %1164 = vmatpush3.msra.mxu0 %v846_v39 }
 0x1c3   : > { %v681_v22 = vmax.f32 %v655_v20, 0.0  ;;  %1165 = vmatprep.subr.mxu0 %v845_v40 }
 0x1c4   : > { %v659_v23 = vpop.f32.mrf.mxu1  ;;  %1166 = vmatpush3.msra.mxu0 %v845_v40 }
 0x1c5   : > { %v660_v24 = vadd.f32 %v1060_v6, %v659_v23  ;;  %1151 = vmatmul.mubr.msk.f32.gmra.mxu0 %vm705_vm1, %v681_v22  ;;  %1167 = vmatprep.subr.mxu0 %v844_v41 }
 0x1c6   : > { %v661_v25 = vpop.f32.mrf.mxu1  ;;  %1168 = vmatpush3.msra.mxu0 %v844_v41 }
 0x1c7   : > { %v682_v26 = vmax.f32 %v660_v24, 0.0  ;;  %1169 = vmatprep.subr.mxu0 %v843_v42 }
 0x1c8   : > { %v664_v27 = vpop.f32.mrf.mxu1  ;;  %1170 = vmatpush3.msra.mxu0 %v843_v42 }
 0x1c9   : > { %v665_v28 = vadd.f32 %v1060_v6, %v664_v27  ;;  %1153 = vmatprep.mubr.msk.f32.mxu0 %vm705_vm1, %v682_v26 }
 0x1ca   : > { %v666_v29 = vpop.f32.mrf.mxu1 }
 0x1cb   : > { %v683_v30 = vmax.f32 %v665_v28, 0.0 }
 0x1cc   : > { %v669_v31 = vpop.f32.mrf.mxu1 }
 0x1cd   : > { %v670_v32 = vadd.f32 %v1060_v6, %v669_v31  ;;  %1154 = vmatmul.mubr.msk.f32.gmra.mxu0 %vm705_vm1, %v683_v30 }
 0x1ce   : > { %v671_v33 = vpop.f32.mrf.mxu1 }
 0x1cf   : > { %v684_v34 = vmax.f32 %v670_v32, 0.0 }
 0x1d0   : > { %v674_v35 = vpop.f32.mrf.mxu1 }
 0x1d1   : > { %v675_v36 = vadd.f32 %v1060_v6, %v674_v35  ;;  %1156 = vmatprep.mubr.msk.f32.mxu0 %vm705_vm1, %v684_v34 }
 0x1d2   : > { %v676_v37 = vpop.f32.mrf.mxu1 }
 0x1d3   : > { %v685_v38 = vmax.f32 %v675_v36, 0.0 }
 0x1d5   : > { %1157 = vmatmul.mubr.msk.f32.gmra.mxu0 %vm705_vm1, %v685_v38 }
 0x27d   : > { %v1149_v44 = vpop.f32.mrf.mxu0 }
 0x27e   : > { %v802_v45 = vadd.f32 %v1149_v44, %v1069_v43 }
 0x27f   : > { %v796_v46 = vpop.f32.mrf.mxu0 }
 0x280   : > { %v797_v47 = vadd.f32 %v1069_v43, %v796_v46  ;;  %v836_v49 = vmax.f32 %v802_v45, 0.0 }
 0x282   : > { %v835_v48 = vmax.f32 %v797_v47, 0.0 }
 0x284   : > { %1171 = vmatprep.mubr.msk.f32.mxu0 %vm856_vm2, %v835_v48 }
 0x285   : > { %v1152_v50 = vpop.f32.mrf.mxu0  ;;  %1172 = vmatmul.mubr.msk.f32.vlgmr.msra.gmra.mxu0 %vm856_vm2, %v836_v49 }
 0x286   : > { %v812_v51 = vadd.f32 %v1152_v50, %v1069_v43 }
 0x287   : > { %v806_v52 = vpop.f32.mrf.mxu0 }
 0x288   : > { %v807_v53 = vadd.f32 %v1069_v43, %v806_v52  ;;  %v838_v55 = vmax.f32 %v812_v51, 0.0 }
 0x28a   : > { %v837_v54 = vmax.f32 %v807_v53, 0.0 }
 0x28c   : > { %1174 = vmatprep.mubr.msk.f32.mxu0 %vm856_vm2, %v837_v54 }
 0x28d   : > { %v1155_v56 = vpop.f32.mrf.mxu0  ;;  %1175 = vmatmul.mubr.msk.f32.gmra.mxu0 %vm856_vm2, %v838_v55 }
 0x28e   : > { %v822_v57 = vadd.f32 %v1155_v56, %v1069_v43 }
 0x28f   : > { %v816_v58 = vpop.f32.mrf.mxu0 }
 0x290   : > { %v817_v59 = vadd.f32 %v1069_v43, %v816_v58  ;;  %v840_v61 = vmax.f32 %v822_v57, 0.0 }
 0x292   : > { %v839_v60 = vmax.f32 %v817_v59, 0.0 }
 0x294   : > { %1177 = vmatprep.mubr.msk.f32.mxu1 %vm856_vm2, %v839_v60 }
 0x295   : > { %v1158_v62 = vpop.f32.mrf.mxu0  ;;  %1178 = vmatmul.mubr.msk.f32.vlgmr.msra.gmra.mxu1 %vm856_vm2, %v840_v61 }
 0x296   : > { %v832_v63 = vadd.f32 %v1158_v62, %v1069_v43 }
 0x297   : > { %v826_v0 = vpop.f32.mrf.mxu0 }
 0x298   : > { %v827_v1 = vadd.f32 %v1069_v43, %v826_v0  ;;  %v842_v3 = vmax.f32 %v832_v63, 0.0 }
 0x29a   : > { %v841_v2 = vmax.f32 %v827_v1, 0.0 }
 0x29c   : > { %1180 = vmatprep.mubr.msk.f32.mxu1 %vm856_vm2, %v841_v2 }
 0x29d   : > { %1181 = vmatmul.mubr.msk.f32.gmra.mxu1 %vm856_vm2, %v842_v3 }
 0x345   : > { %v1173_v5 = vpop.f32.mrf.mxu0 }
 0x346   : > { %v953_v6 = vadd.f32 %v1173_v5, %v1078_v4 }
 0x347   : > { %v947_v7 = vpop.f32.mrf.mxu0 }
 0x348   : > { %988 = vst.msk [vmem:[%s334_s28 + $0x8] sm:$0xff] %vm986_vm3, %v953_v6  ;;  %v948_v8 = vadd.f32 %v1078_v4, %v947_v7 }
 0x34a   : > { %987 = vst.msk [vmem:[%s334_s28] sm:$0xff] %vm986_vm3, %v948_v8 }
 0x34d   : > { %v1176_v9 = vpop.f32.mrf.mxu0 }
 0x34e   : > { %v963_v10 = vadd.f32 %v1176_v9, %v1078_v4 }
 0x34f   : > { %v957_v11 = vpop.f32.mrf.mxu0 }
 0x350   : > { %990 = vst.msk [vmem:[%s334_s28 + $0x18] sm:$0xff] %vm986_vm3, %v963_v10  ;;  %v958_v12 = vadd.f32 %v1078_v4, %v957_v11 }
 0x352   : > { %989 = vst.msk [vmem:[%s334_s28 + $0x10] sm:$0xff] %vm986_vm3, %v958_v12 }
 0x355   : > { %v1179_v13 = vpop.f32.mrf.mxu1 }
 0x356   : > { %v973_v14 = vadd.f32 %v1179_v13, %v1078_v4 }
 0x357   : > { %v967_v15 = vpop.f32.mrf.mxu1 }
 0x358   : > { %992 = vst.msk [vmem:[%s334_s28 + $0x28] sm:$0xff] %vm986_vm3, %v973_v14  ;;  %v968_v16 = vadd.f32 %v1078_v4, %v967_v15 }
 0x35a   : > { %991 = vst.msk [vmem:[%s334_s28 + $0x20] sm:$0xff] %vm986_vm3, %v968_v16 }
 0x35d   : > { %v1182_v17 = vpop.f32.mrf.mxu1 }
 0x35e   : > { %v983_v18 = vadd.f32 %v1182_v17, %v1078_v4 }
 0x35f   : > { %v977_v19 = vpop.f32.mrf.mxu1 }
 0x360   : > { %994 = vst.msk [vmem:[%s334_s28 + $0x38] sm:$0xff] %vm986_vm3, %v983_v18  ;;  %v978_v20 = vadd.f32 %v1078_v4, %v977_v19 }
 0x362   : > { %993 = vst.msk [vmem:[%s334_s28 + $0x30] sm:$0xff] %vm986_vm3, %v978_v20 }
 0x363 PF: > { %s19_s30 = sadd.s32 1, %s1210_s30  }
 0x364   : > { %p16_p4 = scmp.ge.s32.totalorder %s19_s30, 4  }
 0x366   :  { %18 = sbr.rel (!%p16_p4) target bundleno = 1 (0x1), region = 86 }

</bundles_post_ra>
